<compile_context>
chip_gen: v7x
topology: tpu7x:2x2x1
jax: 0.10.0
libtpu: 0.0.40
codegen_flags: <defaults>
</compile_context>

<pallas_src>
import functools

import jax
import jax.numpy as jnp
from jax.experimental import pallas as pl
from jax.experimental.pallas import tpu as pltpu


def _round_up(x, m):
    return ((x + m - 1) // m) * m


def _cdiv(a, b):
    return -(-a // b)


def _device_defaults():
    """Per-generation defaults: (batch tile size, label-axis alignment)."""
    try:
        kind = jax.devices()[0].device_kind.lower()
    except Exception:
        kind = ""
    if "v5" in kind:   # v5e: 16 MiB default scoped VMEM, 128-wide MXU
        return 256, 128
    if "v6" in kind:   # v6e: 128 MiB VMEM, 256-wide MXU
        return 512, 256
    return 256, 256    # v7x / unknown: 64 MiB VMEM (32 MiB scoped), 256-wide MXU


# ---------------------------------------------------------------------------
# Kernel: per-audio-tile projection + L2-norm + scaled similarity + per-row
# softmax cross-entropy (padded label columns and padded batch rows masked).
# ---------------------------------------------------------------------------
def clap_audio_kernel(audio_ref, wa_ref, ba_ref, t_ref, y_ref, scale_ref,
                      logits_ref, loss_ref, *, num_labels, batch, tile_rows):
    # --- audio projection head (bf16 operands -> f32 accumulate) + L2 normalize ---
    a = jnp.dot(audio_ref[...], wa_ref[...],
                preferred_element_type=jnp.float32) + ba_ref[...]
    a = a * jax.lax.rsqrt(jnp.sum(a * a, axis=-1, keepdims=True) + 1e-12)

    # --- logits_per_audio = logit_scale * A @ T^T ---
    # Contract the last dim of both operands: no explicit transpose of T.
    scale = scale_ref[0, 0]
    logits = scale * jax.lax.dot_general(
        a.astype(t_ref.dtype), t_ref[...],
        dimension_numbers=(((1,), (1,)), ((), ())),
        preferred_element_type=jnp.float32)
    logits_ref[...] = logits.astype(logits_ref.dtype)

    # --- CrossEntropyLoss, per-row, in f32 ---
    col = jax.lax.broadcasted_iota(jnp.int32, logits.shape, 1)
    valid_col = col < num_labels
    masked = jnp.where(valid_col, logits, jnp.float32(-1e30))
    m = jnp.max(masked, axis=-1, keepdims=True)                              # (TB,1)
    lse = m + jnp.log(jnp.sum(jnp.exp(masked - m), axis=-1, keepdims=True))  # (TB,1)
    tgt_mask = col == y_ref[...]                                             # (TB,Lp)
    tgt = jnp.sum(jnp.where(tgt_mask, logits, 0.0), axis=-1, keepdims=True)  # (TB,1)
    # Row-validity mask: padded batch rows contribute exactly 0 to the loss sum.
    row = pl.program_id(0) * tile_rows + jax.lax.broadcasted_iota(
        jnp.int32, (tile_rows, 1), 0)
    loss_ref[...] = jnp.where(row < batch, lse - tgt, 0.0)


def clap_zero_shot_forward(audio_feats, text_feats, wa, ba, wt, bt,
                           logit_scale, y, *, tile_b=None, label_align=None,
                           mxu_dtype=jnp.bfloat16, logits_dtype=jnp.float32):
    """Returns (loss, logits_per_audio) matching CLAPZeroShotClassifier.forward."""
    B, Da = audio_feats.shape
    L, Dt = text_feats.shape
    P = wa.shape[1]

    d_tile_b, d_align = _device_defaults()
    tile_b = d_tile_b if tile_b is None else tile_b
    label_align = d_align if label_align is None else label_align

    # ---- text path (run once): tiny matmul + L2-norm in plain XLA, then pad ----
    t = jnp.dot(text_feats.astype(jnp.float32), jnp.asarray(wt, jnp.float32),
                preferred_element_type=jnp.float32) + jnp.asarray(bt, jnp.float32)
    t = t * jax.lax.rsqrt(jnp.sum(t * t, axis=-1, keepdims=True) + 1e-12)
    Lp = _round_up(max(L, 1), label_align)
    t_p = jnp.zeros((Lp, P), mxu_dtype).at[:L].set(t.astype(mxu_dtype))

    # ---- adaptive batch tiling: minimal padding, even tile count for megacore ----
    if B <= 8:
        n_tiles = 1
    else:
        n_tiles = max(2, _cdiv(B, tile_b))
        n_tiles += n_tiles % 2              # even tile count -> both v7x cores busy
    TB = _round_up(_cdiv(B, n_tiles), 8)
    n_tiles = _cdiv(B, TB)
    Bp = n_tiles * TB

    if Bp != B:
        audio_p = jnp.zeros((Bp, Da), mxu_dtype).at[:B].set(
            audio_feats.astype(mxu_dtype))
        y_p = jnp.zeros((Bp,), jnp.int32).at[:B].set(y.astype(jnp.int32))
    else:
        audio_p = audio_feats.astype(mxu_dtype)
        y_p = y.astype(jnp.int32)
    y_p = y_p.reshape(Bp, 1)

    wa_c = jnp.asarray(wa, mxu_dtype)
    ba2d = jnp.asarray(ba, jnp.float32).reshape(1, P)
    scale2d = jnp.reshape(logit_scale, (1, 1)).astype(jnp.float32)

    # ---- scoped-VMEM limit: raise only if the pipelined footprint needs it ----
    mxu_bytes = jnp.dtype(mxu_dtype).itemsize
    out_bytes = jnp.dtype(logits_dtype).itemsize
    vmem_est = (2 * TB * Da * mxu_bytes            # double-buffered audio tile
                + 2 * TB * Lp * out_bytes          # double-buffered logits tile
                + 2 * TB * 8                       # y + per-row loss tiles
                + Da * P * mxu_bytes + P * 4       # resident wa, ba
                + Lp * P * mxu_bytes)              # resident normalized text
    vmem_limit = None
    if vmem_est > 12 * 1024 * 1024:
        vmem_limit = int(min(max(2 * vmem_est, 32 * 1024 * 1024), 96 * 1024 * 1024))

    kernel = functools.partial(clap_audio_kernel,
                               num_labels=L, batch=B, tile_rows=TB)

    def run(single_buffer_invariants):
        inv = {"pipeline_mode": pl.Buffered(1)} if single_buffer_invariants else {}
        in_specs = [
            pl.BlockSpec((TB, Da), lambda i: (i, 0)),                  # audio tile
            pl.BlockSpec((Da, P), lambda i: (0, 0), **inv),            # wa (resident)
            pl.BlockSpec((1, P), lambda i: (0, 0), **inv),             # ba (resident)
            pl.BlockSpec((Lp, P), lambda i: (0, 0), **inv),            # text (resident)
            pl.BlockSpec((TB, 1), lambda i: (i, 0)),                   # int targets
            pl.BlockSpec(memory_space=pltpu.MemorySpace.SMEM),         # logit scale
        ]
        return pl.pallas_call(
            kernel,
            grid=(n_tiles,),
            in_specs=in_specs,
            out_specs=[
                pl.BlockSpec((TB, Lp), lambda i: (i, 0)),              # lane-dense logits
                pl.BlockSpec((TB, 1), lambda i: (i, 0)),               # per-row loss
            ],
            out_shape=(
                jax.ShapeDtypeStruct((Bp, Lp), logits_dtype),
                jax.ShapeDtypeStruct((Bp, 1), jnp.float32),
            ),
            compiler_params=pltpu.CompilerParams(
                dimension_semantics=("parallel",),
                vmem_limit_bytes=vmem_limit),
        )(audio_p, wa_c, ba2d, t_p, y_p, scale2d)

    try:
        logits_p, loss_rows = run(True)
    except Exception:
        # Fallback if this jax build rejects single-buffered invariant operands.
        logits_p, loss_rows = run(False)

    logits = logits_p[:B, :L]
    loss = jnp.sum(loss_rows) / B          # padded rows were zeroed in-kernel
    return loss, logits


def reference_forward(audio_feats, text_feats, wa, ba, wt, bt, logit_scale, y,
                      mxu_dtype=jnp.bfloat16):
    """Pure-JAX reference using the same bf16-operand / f32-accumulate matmuls."""
    a = jnp.dot(audio_feats.astype(mxu_dtype), wa.astype(mxu_dtype),
                preferred_element_type=jnp.float32) + ba
    a = a * jax.lax.rsqrt(jnp.sum(a * a, axis=-1, keepdims=True) + 1e-12)
    t = jnp.dot(text_feats, wt, preferred_element_type=jnp.float32) + bt
    t = t * jax.lax.rsqrt(jnp.sum(t * t, axis=-1, keepdims=True) + 1e-12)
    logits = logit_scale * jnp.dot(a.astype(mxu_dtype), t.astype(mxu_dtype).T,
                                   preferred_element_type=jnp.float32)
    lse = jax.scipy.special.logsumexp(logits, axis=-1)
    tgt = jnp.take_along_axis(logits, y[:, None], axis=-1)[:, 0]
    return jnp.mean(lse - tgt), logits


if __name__ == "__main__":
    key = jax.random.PRNGKey(0)
    k0, k1, k2, k3, k4, k5, k6 = jax.random.split(key, 7)

    B = 20        # audio clips: 2 batch tiles -> exercises parallel grid + row mask
    L = 10        # zero-shot text labels: exercises label-axis lane padding
    Da = 128      # pooled audio-encoder feature dim
    Dt = 128      # pooled text-encoder feature dim
    P = 128       # shared projection dim

    # "Encoder outputs" (pooled features) and deterministic projection weights.
    audio_feats = jax.random.normal(k0, (B, Da), dtype=jnp.float32)
    text_feats = jax.random.normal(k1, (L, Dt), dtype=jnp.float32)
    wa = jax.random.normal(k2, (Da, P), dtype=jnp.float32) * (1.0 / jnp.sqrt(Da))
    ba = jax.random.normal(k3, (1, P), dtype=jnp.float32) * 0.01
    wt = jax.random.normal(k4, (Dt, P), dtype=jnp.float32) * (1.0 / jnp.sqrt(Dt))
    bt = jax.random.normal(k5, (1, P), dtype=jnp.float32) * 0.01
    logit_scale = jnp.exp(jnp.log(jnp.float32(1.0 / 0.07)))  # CLAP default temp
    y = jax.random.randint(k6, (B,), 0, L, dtype=jnp.int32)  # class-index targets

    loss, logits = clap_zero_shot_forward(
        audio_feats, text_feats, wa, ba, wt, bt, logit_scale, y)
    jax.block_until_ready((loss, logits))

    ref_loss, ref_logits = reference_forward(
        audio_feats, text_feats, wa, ba, wt, bt, logit_scale, y)

    assert logits.shape == (B, L)
    assert jnp.allclose(logits, ref_logits, atol=5e-3, rtol=5e-3), (
        float(jnp.max(jnp.abs(logits - ref_logits))))
    assert jnp.allclose(loss, ref_loss, atol=5e-3, rtol=5e-3), (
        float(jnp.abs(loss - ref_loss)))
    print("KERNEL_OK")
</pallas_src>

<mosaic_0001>
module attributes {stable_mosaic.version = 11 : i64} {
  func.func @clap_audio_kernel(%arg0: i32, %arg1: memref<16x128xbf16, #tpu.memory_space<vmem>>, %arg2: memref<128x128xbf16, #tpu.memory_space<vmem>>, %arg3: memref<1x128xf32, #tpu.memory_space<vmem>>, %arg4: memref<256x128xbf16, #tpu.memory_space<vmem>>, %arg5: memref<16x1xi32, #tpu.memory_space<vmem>>, %arg6: memref<1x1xf32, #tpu.memory_space<smem>>, %arg7: memref<16x256xf32, #tpu.memory_space<vmem>>, %arg8: memref<16x1xf32, #tpu.memory_space<vmem>>) attributes {dimension_semantics = [#tpu.dimension_semantics<parallel>], iteration_bounds = array<i64: 2>, scalar_prefetch = 0 : i64, scratch_operands = 0 : i64, tpu.core_type = #tpu.core_type<tc>, window_params = [{transform_indices = @transform_0, window_bounds = array<i64: 16, 128>}, {pipeline_mode = #tpu.pipeline_mode<synchronous>, transform_indices = @transform_1, window_bounds = array<i64: 128, 128>}, {pipeline_mode = #tpu.pipeline_mode<synchronous>, transform_indices = @transform_2, window_bounds = array<i64: 1, 128>}, {pipeline_mode = #tpu.pipeline_mode<synchronous>, transform_indices = @transform_3, window_bounds = array<i64: 256, 128>}, {transform_indices = @transform_4, window_bounds = array<i64: 16, 1>}, {transform_indices = @transform_5, window_bounds = array<i64: 1, 1>}, {transform_indices = @transform_6, window_bounds = array<i64: 16, 256>}, {transform_indices = @transform_7, window_bounds = array<i64: 16, 1>}]} {
    %c0 = arith.constant 0 : index
    %c0_0 = arith.constant 0 : index
    %0 = vector.load %arg1[%c0, %c0_0] : memref<16x128xbf16, #tpu.memory_space<vmem>>, vector<16x128xbf16>
    %c0_1 = arith.constant 0 : index
    %c0_2 = arith.constant 0 : index
    %1 = vector.load %arg2[%c0_1, %c0_2] : memref<128x128xbf16, #tpu.memory_space<vmem>>, vector<128x128xbf16>
    %cst = arith.constant dense<0.000000e+00> : vector<16x128xf32>
    %2 = tpu.matmul %0, %1, %cst {dimension_numbers = #tpu.dot_dimension_numbers<[1], [0], [0], [1], [0, 0, 1, 1], [], []>} : vector<16x128xbf16>, vector<128x128xbf16>, vector<16x128xf32> -> vector<16x128xf32>
    %c0_3 = arith.constant 0 : index
    %c0_4 = arith.constant 0 : index
    %3 = vector.load %arg3[%c0_3, %c0_4] : memref<1x128xf32, #tpu.memory_space<vmem>>, vector<1x128xf32>
    %4 = vector.broadcast %3 : vector<1x128xf32> to vector<16x128xf32>
    %5 = arith.addf %2, %4 : vector<16x128xf32>
    %6 = arith.mulf %5, %5 : vector<16x128xf32>
    %cst_5 = arith.constant dense<0.000000e+00> : vector<16xf32>
    %7 = vector.multi_reduction <add>, %6, %cst_5 [1] : vector<16x128xf32> to vector<16xf32>
    %8 = vector.shape_cast %7 : vector<16xf32> to vector<16x1xf32>
    %cst_6 = arith.constant 9.99999996E-13 : f32
    %9 = vector.broadcast %cst_6 : f32 to vector<16x1xf32>
    %10 = arith.addf %8, %9 : vector<16x1xf32>
    %11 = math.rsqrt %10 : vector<16x1xf32>
    %12 = vector.broadcast %11 : vector<16x1xf32> to vector<16x128xf32>
    %13 = arith.mulf %5, %12 : vector<16x128xf32>
    %c0_7 = arith.constant 0 : index
    %c0_8 = arith.constant 0 : index
    %14 = memref.load %arg6[%c0_7, %c0_8] : memref<1x1xf32, #tpu.memory_space<smem>>
    %15 = arith.truncf %13 : vector<16x128xf32> to vector<16x128xbf16>
    %c0_9 = arith.constant 0 : index
    %c0_10 = arith.constant 0 : index
    %16 = vector.load %arg4[%c0_9, %c0_10] : memref<256x128xbf16, #tpu.memory_space<vmem>>, vector<256x128xbf16>
    %cst_11 = arith.constant dense<0.000000e+00> : vector<16x256xf32>
    %17 = tpu.matmul %15, %16, %cst_11 {dimension_numbers = #tpu.dot_dimension_numbers<[1], [1], [0], [0], [0, 0, 1, 0], [], []>} : vector<16x128xbf16>, vector<256x128xbf16>, vector<16x256xf32> -> vector<16x256xf32>
    %18 = vector.broadcast %14 : f32 to vector<16x256xf32>
    %19 = arith.mulf %18, %17 : vector<16x256xf32>
    %c0_12 = arith.constant 0 : index
    %c0_13 = arith.constant 0 : index
    %20 = vector.load %arg7[%c0_12, %c0_13] : memref<16x256xf32, #tpu.memory_space<vmem>>, vector<16x256xf32>
    tpu.vector_store %arg7[%c0_12, %c0_13], %19 {strides = array<i32>} : memref<16x256xf32, #tpu.memory_space<vmem>>, vector<16x256xf32>,
    %21 = tpu.iota {dimensions = array<i32: 1>} : vector<16x256xi32>
    %c10_i32 = arith.constant 10 : i32
    %22 = vector.broadcast %c10_i32 : i32 to vector<16x256xi32>
    %23 = arith.cmpi slt, %21, %22 : vector<16x256xi32>
    %cst_14 = arith.constant -1.000000e+30 : f32
    %24 = vector.broadcast %cst_14 : f32 to vector<16x256xf32>
    %25 = arith.select %23, %19, %24 : vector<16x256xi1>, vector<16x256xf32>
    %cst_15 = arith.constant dense<0xFF800000> : vector<16xf32>
    %26 = vector.multi_reduction <maximumf>, %25, %cst_15 [1] : vector<16x256xf32> to vector<16xf32>
    %27 = vector.shape_cast %26 : vector<16xf32> to vector<16x1xf32>
    %28 = vector.broadcast %27 : vector<16x1xf32> to vector<16x256xf32>
    %29 = arith.subf %25, %28 : vector<16x256xf32>
    %30 = math.exp %29 : vector<16x256xf32>
    %cst_16 = arith.constant dense<0.000000e+00> : vector<16xf32>
    %31 = vector.multi_reduction <add>, %30, %cst_16 [1] : vector<16x256xf32> to vector<16xf32>
    %32 = vector.shape_cast %31 : vector<16xf32> to vector<16x1xf32>
    %33 = math.log %32 : vector<16x1xf32>
    %34 = arith.addf %27, %33 : vector<16x1xf32>
    %c0_17 = arith.constant 0 : index
    %c0_18 = arith.constant 0 : index
    %35 = vector.load %arg5[%c0_17, %c0_18] : memref<16x1xi32, #tpu.memory_space<vmem>>, vector<16x1xi32>
    %36 = vector.broadcast %35 : vector<16x1xi32> to vector<16x256xi32>
    %37 = arith.cmpi eq, %21, %36 : vector<16x256xi32>
    %cst_19 = arith.constant 0.000000e+00 : f32
    %38 = vector.broadcast %cst_19 : f32 to vector<16x256xf32>
    %39 = arith.select %37, %19, %38 : vector<16x256xi1>, vector<16x256xf32>
    %cst_20 = arith.constant dense<0.000000e+00> : vector<16xf32>
    %40 = vector.multi_reduction <add>, %39, %cst_20 [1] : vector<16x256xf32> to vector<16xf32>
    %41 = vector.shape_cast %40 : vector<16xf32> to vector<16x1xf32>
    %c16_i32 = arith.constant 16 : i32
    %42 = arith.muli %arg0, %c16_i32 : i32
    %43 = tpu.iota {dimensions = array<i32: 0>} : vector<16x1xi32>
    %44 = vector.broadcast %42 : i32 to vector<16x1xi32>
    %45 = arith.addi %44, %43 : vector<16x1xi32>
    %c20_i32 = arith.constant 20 : i32
    %46 = vector.broadcast %c20_i32 : i32 to vector<16x1xi32>
    %47 = arith.cmpi slt, %45, %46 : vector<16x1xi32>
    %48 = arith.subf %34, %41 : vector<16x1xf32>
    %cst_21 = arith.constant 0.000000e+00 : f32
    %49 = vector.broadcast %cst_21 : f32 to vector<16x1xf32>
    %50 = arith.select %47, %48, %49 : vector<16x1xi1>, vector<16x1xf32>
    %c0_22 = arith.constant 0 : index
    %c0_23 = arith.constant 0 : index
    %51 = vector.load %arg8[%c0_22, %c0_23] : memref<16x1xf32, #tpu.memory_space<vmem>>, vector<16x1xf32>
    tpu.vector_store %arg8[%c0_22, %c0_23], %50 {strides = array<i32>} : memref<16x1xf32, #tpu.memory_space<vmem>>, vector<16x1xf32>,
    return
  }
  func.func @transform_0(%arg0: i32) -> (i32, i32) {
    %c0_i32 = arith.constant 0 : i32
    %c0_i32_0 = arith.constant 0 : i32
    return %arg0, %c0_i32 : i32, i32
  }
  func.func @transform_1(%arg0: i32) -> (i32, i32) {
    %c0_i32 = arith.constant 0 : i32
    %c0_i32_0 = arith.constant 0 : i32
    %c0_i32_1 = arith.constant 0 : i32
    return %c0_i32, %c0_i32_0 : i32, i32
  }
  func.func @transform_2(%arg0: i32) -> (i32, i32) {
    %c0_i32 = arith.constant 0 : i32
    %c0_i32_0 = arith.constant 0 : i32
    %c0_i32_1 = arith.constant 0 : i32
    return %c0_i32, %c0_i32_0 : i32, i32
  }
  func.func @transform_3(%arg0: i32) -> (i32, i32) {
    %c0_i32 = arith.constant 0 : i32
    %c0_i32_0 = arith.constant 0 : i32
    %c0_i32_1 = arith.constant 0 : i32
    return %c0_i32, %c0_i32_0 : i32, i32
  }
  func.func @transform_4(%arg0: i32) -> (i32, i32) {
    %c0_i32 = arith.constant 0 : i32
    %c0_i32_0 = arith.constant 0 : i32
    return %arg0, %c0_i32 : i32, i32
  }
  func.func @transform_5(%arg0: i32) -> (i32, i32) {
    %c0_i32 = arith.constant 0 : i32
    %c0_i32_0 = arith.constant 0 : i32
    %c0_i32_1 = arith.constant 0 : i32
    return %c0_i32, %c0_i32_0 : i32, i32
  }
  func.func @transform_6(%arg0: i32) -> (i32, i32) {
    %c0_i32 = arith.constant 0 : i32
    %c0_i32_0 = arith.constant 0 : i32
    return %arg0, %c0_i32 : i32, i32
  }
  func.func @transform_7(%arg0: i32) -> (i32, i32) {
    %c0_i32 = arith.constant 0 : i32
    %c0_i32_0 = arith.constant 0 : i32
    return %arg0, %c0_i32 : i32, i32
  }
}

module attributes {stable_mosaic.version = 11 : i64} {
  func.func @clap_audio_kernel(%arg0: i32, %arg1: memref<16x128xbf16, #tpu.memory_space<vmem>>, %arg2: memref<128x128xbf16, #tpu.memory_space<vmem>>, %arg3: memref<1x128xf32, #tpu.memory_space<vmem>>, %arg4: memref<256x128xbf16, #tpu.memory_space<vmem>>, %arg5: memref<16x1xi32, #tpu.memory_space<vmem>>, %arg6: memref<1x1xf32, #tpu.memory_space<smem>>, %arg7: memref<16x256xf32, #tpu.memory_space<vmem>>, %arg8: memref<16x1xf32, #tpu.memory_space<vmem>>) attributes {dimension_semantics = [#tpu.dimension_semantics<parallel>], iteration_bounds = array<i64: 2>, scalar_prefetch = 0 : i64, scratch_operands = 0 : i64, tpu.core_type = #tpu.core_type<tc>, window_params = [{transform_indices = @transform_0, window_bounds = array<i64: 16, 128>}, {pipeline_mode = #tpu.pipeline_mode<synchronous>, transform_indices = @transform_1, window_bounds = array<i64: 128, 128>}, {pipeline_mode = #tpu.pipeline_mode<synchronous>, transform_indices = @transform_2, window_bounds = array<i64: 1, 128>}, {pipeline_mode = #tpu.pipeline_mode<synchronous>, transform_indices = @transform_3, window_bounds = array<i64: 256, 128>}, {transform_indices = @transform_4, window_bounds = array<i64: 16, 1>}, {transform_indices = @transform_5, window_bounds = array<i64: 1, 1>}, {transform_indices = @transform_6, window_bounds = array<i64: 16, 256>}, {transform_indices = @transform_7, window_bounds = array<i64: 16, 1>}]} {
    %c0 = arith.constant 0 : index
    %c0_0 = arith.constant 0 : index
    %0 = vector.load %arg1[%c0, %c0_0] : memref<16x128xbf16, #tpu.memory_space<vmem>>, vector<16x128xbf16>
    %c0_1 = arith.constant 0 : index
    %c0_2 = arith.constant 0 : index
    %1 = vector.load %arg2[%c0_1, %c0_2] : memref<128x128xbf16, #tpu.memory_space<vmem>>, vector<128x128xbf16>
    %cst = arith.constant dense<0.000000e+00> : vector<16x128xf32>
    %2 = tpu.matmul %0, %1, %cst {dimension_numbers = #tpu.dot_dimension_numbers<[1], [0], [0], [1], [0, 0, 1, 1], [], []>} : vector<16x128xbf16>, vector<128x128xbf16>, vector<16x128xf32> -> vector<16x128xf32>
    %c0_3 = arith.constant 0 : index
    %c0_4 = arith.constant 0 : index
    %3 = vector.load %arg3[%c0_3, %c0_4] : memref<1x128xf32, #tpu.memory_space<vmem>>, vector<1x128xf32>
    %4 = vector.broadcast %3 : vector<1x128xf32> to vector<16x128xf32>
    %5 = arith.addf %2, %4 : vector<16x128xf32>
    %6 = arith.mulf %5, %5 : vector<16x128xf32>
    %cst_5 = arith.constant dense<0.000000e+00> : vector<16xf32>
    %7 = vector.multi_reduction <add>, %6, %cst_5 [1] : vector<16x128xf32> to vector<16xf32>
    %8 = vector.shape_cast %7 : vector<16xf32> to vector<16x1xf32>
    %cst_6 = arith.constant 9.99999996E-13 : f32
    %9 = vector.broadcast %cst_6 : f32 to vector<16x1xf32>
    %10 = arith.addf %8, %9 : vector<16x1xf32>
    %11 = math.rsqrt %10 : vector<16x1xf32>
    %12 = vector.broadcast %11 : vector<16x1xf32> to vector<16x128xf32>
    %13 = arith.mulf %5, %12 : vector<16x128xf32>
    %c0_7 = arith.constant 0 : index
    %c0_8 = arith.constant 0 : index
    %14 = memref.load %arg6[%c0_7, %c0_8] : memref<1x1xf32, #tpu.memory_space<smem>>
    %15 = arith.truncf %13 : vector<16x128xf32> to vector<16x128xbf16>
    %c0_9 = arith.constant 0 : index
    %c0_10 = arith.constant 0 : index
    %16 = vector.load %arg4[%c0_9, %c0_10] : memref<256x128xbf16, #tpu.memory_space<vmem>>, vector<256x128xbf16>
    %cst_11 = arith.constant dense<0.000000e+00> : vector<16x256xf32>
    %17 = tpu.matmul %15, %16, %cst_11 {dimension_numbers = #tpu.dot_dimension_numbers<[1], [1], [0], [0], [0, 0, 1, 0], [], []>} : vector<16x128xbf16>, vector<256x128xbf16>, vector<16x256xf32> -> vector<16x256xf32>
    %18 = vector.broadcast %14 : f32 to vector<16x256xf32>
    %19 = arith.mulf %18, %17 : vector<16x256xf32>
    %c0_12 = arith.constant 0 : index
    %c0_13 = arith.constant 0 : index
    %20 = vector.load %arg7[%c0_12, %c0_13] : memref<16x256xf32, #tpu.memory_space<vmem>>, vector<16x256xf32>
    tpu.vector_store %arg7[%c0_12, %c0_13], %19 {strides = array<i32>} : memref<16x256xf32, #tpu.memory_space<vmem>>, vector<16x256xf32>,
    %21 = tpu.iota {dimensions = array<i32: 1>} : vector<16x256xi32>
    %c10_i32 = arith.constant 10 : i32
    %22 = vector.broadcast %c10_i32 : i32 to vector<16x256xi32>
    %23 = arith.cmpi slt, %21, %22 : vector<16x256xi32>
    %cst_14 = arith.constant -1.000000e+30 : f32
    %24 = vector.broadcast %cst_14 : f32 to vector<16x256xf32>
    %25 = arith.select %23, %19, %24 : vector<16x256xi1>, vector<16x256xf32>
    %cst_15 = arith.constant dense<0xFF800000> : vector<16xf32>
    %26 = vector.multi_reduction <maximumf>, %25, %cst_15 [1] : vector<16x256xf32> to vector<16xf32>
    %27 = vector.shape_cast %26 : vector<16xf32> to vector<16x1xf32>
    %28 = vector.broadcast %27 : vector<16x1xf32> to vector<16x256xf32>
    %29 = arith.subf %25, %28 : vector<16x256xf32>
    %30 = math.exp %29 : vector<16x256xf32>
    %cst_16 = arith.constant dense<0.000000e+00> : vector<16xf32>
    %31 = vector.multi_reduction <add>, %30, %cst_16 [1] : vector<16x256xf32> to vector<16xf32>
    %32 = vector.shape_cast %31 : vector<16xf32> to vector<16x1xf32>
    %33 = math.log %32 : vector<16x1xf32>
    %34 = arith.addf %27, %33 : vector<16x1xf32>
    %c0_17 = arith.constant 0 : index
    %c0_18 = arith.constant 0 : index
    %35 = vector.load %arg5[%c0_17, %c0_18] : memref<16x1xi32, #tpu.memory_space<vmem>>, vector<16x1xi32>
    %36 = vector.broadcast %35 : vector<16x1xi32> to vector<16x256xi32>
    %37 = arith.cmpi eq, %21, %36 : vector<16x256xi32>
    %cst_19 = arith.constant 0.000000e+00 : f32
    %38 = vector.broadcast %cst_19 : f32 to vector<16x256xf32>
    %39 = arith.select %37, %19, %38 : vector<16x256xi1>, vector<16x256xf32>
    %cst_20 = arith.constant dense<0.000000e+00> : vector<16xf32>
    %40 = vector.multi_reduction <add>, %39, %cst_20 [1] : vector<16x256xf32> to vector<16xf32>
    %41 = vector.shape_cast %40 : vector<16xf32> to vector<16x1xf32>
    %c16_i32 = arith.constant 16 : i32
    %42 = arith.muli %arg0, %c16_i32 : i32
    %43 = tpu.iota {dimensions = array<i32: 0>} : vector<16x1xi32>
    %44 = vector.broadcast %42 : i32 to vector<16x1xi32>
    %45 = arith.addi %44, %43 : vector<16x1xi32>
    %c20_i32 = arith.constant 20 : i32
    %46 = vector.broadcast %c20_i32 : i32 to vector<16x1xi32>
    %47 = arith.cmpi slt, %45, %46 : vector<16x1xi32>
    %48 = arith.subf %34, %41 : vector<16x1xf32>
    %cst_21 = arith.constant 0.000000e+00 : f32
    %49 = vector.broadcast %cst_21 : f32 to vector<16x1xf32>
    %50 = arith.select %47, %48, %49 : vector<16x1xi1>, vector<16x1xf32>
    %c0_22 = arith.constant 0 : index
    %c0_23 = arith.constant 0 : index
    %51 = vector.load %arg8[%c0_22, %c0_23] : memref<16x1xf32, #tpu.memory_space<vmem>>, vector<16x1xf32>
    tpu.vector_store %arg8[%c0_22, %c0_23], %50 {strides = array<i32>} : memref<16x1xf32, #tpu.memory_space<vmem>>, vector<16x1xf32>,
    return
  }
  func.func @transform_0(%arg0: i32) -> (i32, i32) {
    %c0_i32 = arith.constant 0 : i32
    %c0_i32_0 = arith.constant 0 : i32
    return %arg0, %c0_i32 : i32, i32
  }
  func.func @transform_1(%arg0: i32) -> (i32, i32) {
    %c0_i32 = arith.constant 0 : i32
    %c0_i32_0 = arith.constant 0 : i32
    %c0_i32_1 = arith.constant 0 : i32
    return %c0_i32, %c0_i32_0 : i32, i32
  }
  func.func @transform_2(%arg0: i32) -> (i32, i32) {
    %c0_i32 = arith.constant 0 : i32
    %c0_i32_0 = arith.constant 0 : i32
    %c0_i32_1 = arith.constant 0 : i32
    return %c0_i32, %c0_i32_0 : i32, i32
  }
  func.func @transform_3(%arg0: i32) -> (i32, i32) {
    %c0_i32 = arith.constant 0 : i32
    %c0_i32_0 = arith.constant 0 : i32
    %c0_i32_1 = arith.constant 0 : i32
    return %c0_i32, %c0_i32_0 : i32, i32
  }
  func.func @transform_4(%arg0: i32) -> (i32, i32) {
    %c0_i32 = arith.constant 0 : i32
    %c0_i32_0 = arith.constant 0 : i32
    return %arg0, %c0_i32 : i32, i32
  }
  func.func @transform_5(%arg0: i32) -> (i32, i32) {
    %c0_i32 = arith.constant 0 : i32
    %c0_i32_0 = arith.constant 0 : i32
    %c0_i32_1 = arith.constant 0 : i32
    return %c0_i32, %c0_i32_0 : i32, i32
  }
  func.func @transform_6(%arg0: i32) -> (i32, i32) {
    %c0_i32 = arith.constant 0 : i32
    %c0_i32_0 = arith.constant 0 : i32
    return %arg0, %c0_i32 : i32, i32
  }
  func.func @transform_7(%arg0: i32) -> (i32, i32) {
    %c0_i32 = arith.constant 0 : i32
    %c0_i32_0 = arith.constant 0 : i32
    return %arg0, %c0_i32 : i32, i32
  }
}

</mosaic_0001>

<bundles_post_ra>
// kernel: tpu_custom_call.1
= control target key start
LH: loop header
LB: loop body
LE: loop exit
PB: predicated region body
PF: predicated region fallthrough
CT: control target
= control target key end

     0   :  { %s1493_s0 = inlined_call_operand.vmem [shape: bf16[32,128], index: 0, kind: input, shape index: {}]   ;;  %s1494_s1 = inlined_call_operand.hbm [shape: bf16[128,128], index: 1, kind: input, shape index: {}]   ;;  %s1495_s2 = inlined_call_operand.vmem [shape: f32[1,128], index: 2, kind: input, shape index: {}]   ;;  %s1496_s3 = inlined_call_operand.hbm [shape: bf16[256,128], index: 3, kind: input, shape index: {}]   ;;  %s1497_s4 = inlined_call_operand.vmem [shape: s32[32,1], index: 4, kind: input, shape index: {}]   ;;  %s1498_s5 = inlined_call_operand.<no memory space> [shape: f32[1,1], index: 5, kind: input, shape index: {}]   ;;  %s1499_s6 = inlined_call_operand.hbm [shape: f32[32,256], index: 6, kind: output, shape index: {0}]   ;;  %s1500_s7 = inlined_call_operand.vmem [shape: f32[32,1], index: 7, kind: output, shape index: {1}]  }
   0x1   :  { %13 = sst [smem:[#allocation2]] %s1498_s5 }
   0x2   :  { %14 = vsyncpa [#allocation4], 0 }
   0x3   :  { %15 = vsyncpa [#allocation7], 0 }
   0x4   :  { %16 = vsyncpa [#allocation5], 0 }
   0x5   :  { %18 = vsyncpa [#allocation5 + $0x1], 0  ;;  %s1272_s26 = smov 0   ;;  %s1274_s27 = smov 0  }
   0x6   :  { %s1276_s28 = smov 0   ;;  %s1278_s29 = smov 0  }
   0x7 LB: > { %s1293_s5 = sadd.s32 4294967295, %s1217_s29   ;;  %s884_s30 = sadd.s32 4294967294, %s1217_s29   ;;  %s1217_s29 = sphi %s1278_s29, %s1518_s29   ;;  %s1213_s28 = sphi %s1276_s28, %s1517_s28   ;;  %s1209_s27 = sphi %s1274_s27, %s1516_s27   ;;  %s1205_s26 = sphi %s1272_s26, %s1515_s26  }
   0x8   : > { %s1297_s8 = sadd.s32 1, %s1217_s29   ;;  %s167_s9 = sadd.s32 1, %s1213_s28 }
   0x9   : > { %s164_s10 = ssub.s32 %s1217_s29, %s1297_s8  ;;  %p177_p0 = scmp.ne.s32.totalorder %s1213_s28, %s1209_s27 }
   0xa   : > { %p165_p1 = scmp.eq.s32.totalorder %s164_s10, 0  ;;  %p178_p2 = scmp.eq.s32.totalorder %s1293_s5, 1 }
   0xb   : > { %p183_p3 = scmp.ne.s32.totalorder %s1209_s27, %s1205_s26  ;;  %p184_p4 = scmp.eq.s32.totalorder %s884_s30, 1 }
   0xc   : > { %s1308_s11 = scalar_select %p165_p1, %s1213_s28, %s167_s9  }
   0xd   : > { %p1310_p5 = por %p178_p2, %p177_p0  ;;  %p1314_p6 = por %p184_p4, %p183_p3 }
   0xe   : > { %p885_p7 = scmp.ge.s32.totalorder %s1217_s29, 1  ;;  %p217_p8 = scmp.lt.s32.totalorder %s1217_s29, 3 }
   0xf   : > { %s1504_s12 = scalar_select %p1310_p5, 1, 0 }
  0x10   : > { %s1505_s13 = scalar_select %p1314_p6, 1, 0 }
  0x11   : > { %p1501_p9 = scmp.eq.s32.totalorder %s1293_s5, 0  ;;  %p1321_p10 = pnand %p885_p7, %p217_p8 }
  0x12   : > { %s1219_s15 = smov [#allocation3]   ;;  %s1220_s18 = smov [#allocation6]  }
  0x13   : > { %s1506_s14 = scalar_select %p1321_p10, 1, 0 }
  0x14   : > { %s229_s16 = sshll.u32 %s1219_s15, 4  ;;  %p991_p11 = pneg %p1321_p10  ;;  %s230_s16 = int_to_ptr.vmem [resolvable:$true] %s229_s16 }
  0x15   : > { %s245_s19 = sshll.u32 %s1220_s18, 4  ;;  %s1091_s22 = scalar_lea.hbm %s1494_s1, 1024  ;;  %s1333_s19 = int_to_ptr.vmem [resolvable:$true] %s245_s19 }
  0x16   : > { %p1329_p12 = pnand %p1501_p9, %p991_p11  ;;  %p1092_p13 = scmp.ne.s32.totalorder %s1494_s1, %s1091_s22 }
  0x17   : > { %p1098_p3 = scmp.lt.u32.totalorder %s1091_s22, %s1494_s1 }
  0x18   : > { %p1093_p0 = pneg %p1329_p12 }
  0x1a   : > { %p1094_p1 = pnand %p1093_p0, %p1092_p13 }
  0x1c   : > { %p1095_p2 = pneg %p1094_p1 }
  0x1e   : > { %p1100_p4 = pnand %p1098_p3, %p1095_p2 }
  0x20   : > { %1103 = shalt.err (!%p1100_p4)
}
  0x21   : > { %s1104_s9 = scalar_lea.vmem %s230_s16, 1024  ;;  %p1112_p9 = scmp.lt.s32.totalorder %s230_s16, %s230_s16 }
  0x22   : > { %p1105_p7 = scmp.ne.s32.totalorder %s230_s16, %s1104_s9  ;;  %p1113_p6 = scmp.lt.s32.totalorder %s1104_s9, %s1104_s9 }
  0x24   : > { %p1107_p8 = pnand %p1105_p7, %p1093_p0  ;;  %p1114_p5 = por %p1113_p6, %p1112_p9 }
  0x26   : > { %p1108_p11 = pneg %p1107_p8 }
  0x28   : > { %p1115_p10 = pnand %p1114_p5, %p1108_p11 }
  0x2a   : > { %1118 = shalt.err (!%p1115_p10)
}
  0x2b   : > { %s1221_s10 = smov 64   ;;  %s1222_s15 = smov 4  }
  0x2c   : > { %994 = dma.hbm_to_vmem [thread:$0]  (!%p1329_p12), %s1494_s1, 1024, %s230_s16, [#allocation4], %s1221_s10, %s1221_s10, %s1222_s15  }
  0x2d   : > { %s1119_s23 = scalar_lea.hbm %s1496_s3, 2048 }
  0x2e   : > { %p1120_p13 = scmp.ne.s32.totalorder %s1496_s3, %s1119_s23  ;;  %p1126_p9 = scmp.lt.u32.totalorder %s1119_s23, %s1496_s3 }
  0x30   : > { %p1122_p5 = pnand %p1120_p13, %p1093_p0 }
  0x32   : > { %p1123_p6 = pneg %p1122_p5 }
  0x34   : > { %p1128_p10 = pnand %p1126_p9, %p1123_p6 }
  0x36   : > { %1131 = shalt.err (!%p1128_p10)
}
  0x37   : > { %s1132_s16 = scalar_lea.vmem %s1333_s19, 2048  ;;  %p1140_p4 = scmp.lt.s32.totalorder %s1333_s19, %s1333_s19 }
  0x38   : > { %p1133_p1 = scmp.ne.s32.totalorder %s1333_s19, %s1132_s16  ;;  %p1141_p7 = scmp.lt.s32.totalorder %s1132_s16, %s1132_s16 }
  0x3a   : > { %p1135_p2 = pnand %p1133_p1, %p1093_p0  ;;  %p1142_p8 = por %p1141_p7, %p1140_p4 }
  0x3c   : > { %p1136_p3 = pneg %p1135_p2 }
  0x3e   : > { %p1143_p11 = pnand %p1142_p8, %p1136_p3 }
  0x40   : > { %1146 = shalt.err (!%p1143_p11)
}
  0x41   : > { %997 = dma.hbm_to_vmem [thread:$0]  (!%p1329_p12), %s1496_s3, 2048, %s1333_s19, [#allocation7], %s1221_s10, %s1221_s10, %s1222_s15  }
  0x42   : > { %p1508_p13 = scmp.ne.s32.totalorder %s1506_s14, 0 }
  0x43   : > { %p1509_p5 = scmp.eq.s32.totalorder (!%p1508_p13), %s1293_s5, 0 }
  0x44   : > { %282 = sbr.rel (%p1508_p13) target bundleno = 1035 (0x40b), region = 44 }
  0x4b   : > { %1192 = dma.done.wait (%p1509_p5), [#allocation4], 1024   ;;  %p1510_p0 = pmov %p1509_p5 }
  0x4d   : > { %1194 = vsyncadd (%p1510_p0), [#allocation4], 4294966272  ;;  %p1511_p6 = pmov %p1510_p0 }
  0x4e   : > { %p1512_p9 = pmov %p1510_p0 }
  0x4f   : > { %1196 = dma.done.wait (%p1511_p6), [#allocation7], 2048  }
  0x50   : > { %1198 = vsyncadd (%p1512_p9), [#allocation7], 4294965248  ;;  %s893_s17 = sshll.u32 %s1293_s5, 1  ;;  %v1223_v0 = vmov 0.0   ;;  %vm1224_vm0 = vmmov 0   ;;  %v1050_v1 = vld [vmem:[#allocation3] sm:$0xff]   ;;  %v662_v46 = vlaneseq }
  0x51   : > { %961 = vmatprep.subr.bf16.mxu0 %v1223_v0  ;;  %977 = vmatprep.mubr.msk.bf16.mxu0 %vm1224_vm0, %v1223_v0  ;;  %p329_p12 = scmp.lt.s32.totalorder %s893_s17, 3  ;;  %v1051_v2 = vld [vmem:[#allocation3 + $0x8] sm:$0xff]   ;;  %v1052_v3 = vld [vmem:[#allocation3 + $0x10] sm:$0xff]   ;;  %v1053_v4 = vld [vmem:[#allocation3 + $0x18] sm:$0xff]   ;;  %v1225_v35 = vmov 0   ;;  %s480_s9 = sld [smem:[#allocation2]] }
  0x52   : > { %962 = vmatpush3.bf16.msra.mxu0 %v1050_v1  ;;  %v1054_v5 = vld [vmem:[#allocation3 + $0x20] sm:$0xff]   ;;  %v1055_v6 = vld [vmem:[#allocation3 + $0x28] sm:$0xff]   ;;  %v1056_v7 = vld [vmem:[#allocation3 + $0x30] sm:$0xff]   ;;  %1048 = vset.pattern.permute.xlu0 %v1225_v35  ;;  %v663_v47 = vand.u32 127, %v662_v46  ;;  %s318_s16 = sand.u32 1, %s1209_s27   ;;  %s933_s19 = sshll.u32 %s1293_s5, 9 }
  0x53   : > { %s1520_s17 = smov (!%p329_p12, %s893_s17), 3  ;;  %963 = vmatprep.subr.bf16.mxu0 %v1223_v0  ;;  %v1057_v8 = vld [vmem:[#allocation3 + $0x38] sm:$0xff]   ;;  %v1059_v10 = vld [vmem:[#allocation6 + $0x40] sm:$0xff]   ;;  %v1061_v12 = vld [vmem:[#allocation6 + $0x48] sm:$0xff]   ;;  %1049 = vset.pattern.permute.xlu1 %v1225_v35  ;;  %s892_s18 = sshll.u32 %s318_s16, 5 }
  0x54   : > { %s894_s14 = sshll.u32 %s1520_s17, 2  ;;  %v1060_v11 = vld [vmem:[#allocation6] sm:$0xff]   ;;  %943 = vmatprep.subr.bf16.mxu1 %v1059_v10  ;;  %v1062_v13 = vld [vmem:[#allocation6 + $0x8] sm:$0xff]   ;;  %v1063_v14 = vld [vmem:[#allocation6 + $0x50] sm:$0xff]   ;;  %s896_s23 = sshll.u32 %s1520_s17, 3  ;;  %v664_v48 = vadd.s32 128, %v663_v47 }
  0x55   : > { %s332_s15 = scalar_lea.vmem %s1493_s0, %s894_s14  ;;  %944 = vmatpush3.bf16.xpose.msra.mxu1 %v1060_v11  ;;  %v1064_v15 = vld [vmem:[#allocation6 + $0x10] sm:$0xff]   ;;  %v1065_v16 = vld [vmem:[#allocation6 + $0x58] sm:$0xff]   ;;  %v1067_v18 = vld [vmem:[#allocation6 + $0x60] sm:$0xff]   ;;  %s1408_s30 = scalar_lea.vmem %s1497_s4, %s896_s23  ;;  %vm665_vm2 = vcmp.lt.s32.totalorder %v663_v47, 10 }
  0x56   : > { %964 = vmatpush3.bf16.msra.mxu0 %v1051_v2  ;;  %v1058_v9 = vld [vmem:[%s332_s15] sm:$0xff]   ;;  %945 = vmatprep.subr.bf16.mxu1 %v1061_v12  ;;  %v1066_v17 = vld [vmem:[#allocation6 + $0x18] sm:$0xff]   ;;  %v1069_v20 = vld [vmem:[#allocation6 + $0x68] sm:$0xff]   ;;  %s1415_s20 = scalar_lea.vmem [#allocation8], %s892_s18  ;;  %s1439_s21 = scalar_lea.hbm %s1499_s6, %s933_s19 }
  0x57   : > { %965 = vmatprep.subr.bf16.mxu0 %v1223_v0  ;;  %v1068_v19 = vld [vmem:[#allocation6 + $0x20] sm:$0xff]   ;;  %v1070_v21 = vld [vmem:[#allocation6 + $0x28] sm:$0xff]   ;;  %v1071_v31 = vld [vmem:[#allocation6 + $0x70] sm:$0xff]   ;;  %v653_v50 = vstv %s480_s9  ;;  %s759_s14 = sshll.u32 %s1415_s20, 4  ;;  %s1443_s22 = scalar_lea.sflag [#allocation5], %s318_s16  ;;  %s1433_s14 = int_to_ptr.vmem [resolvable:$true] %s759_s14 }
  0x58   : > { %v899_v22 = vld [vmem:[%s1495_s2] ss:$0 sm:$0xff]  ;;  %v1072_v32 = vld [vmem:[#allocation6 + $0x30] sm:$0xff]   ;;  %v1073_v33 = vld [vmem:[#allocation6 + $0x78] sm:$0xff]   ;;  %s1147_s24 = scalar_lea.vmem %s1433_s14, 512  ;;  %p1513_p1 = scmp.ne.s32.totalorder %s1504_s12, 0 }
  0x59   : > { %v1074_v34 = vld [vmem:[#allocation6 + $0x38] sm:$0xff]   ;;  %v701_v36 = vld [vmem:[%s1408_s30] sm:$0xff]  ;;  %v702_v2 = vld [vmem:[%s1408_s30 + $0x8] sm:$0xff]  ;;  %p1148_p10 = scmp.ne.s32.totalorder %s1433_s14, %s1147_s24  ;;  %s1226_s25 = smov [#allocation8]  }
  0x5a   : > { %966 = vmatpush3.bf16.msra.mxu0 %v1052_v3  ;;  %s1151_s30 = sshll.u32 %s1226_s25, 4  ;;  %s1152_s30 = int_to_ptr.vmem [resolvable:$false] %s1151_s30 }
  0x5b   : > { %967 = vmatprep.subr.bf16.mxu0 %v1223_v0  ;;  %p1149_p2 = pnand %p1148_p10, %p1513_p1  ;;  %s1153_s9 = scalar_lea.vmem %s1152_s30, 1024 }
  0x5c   : > { %p1154_p4 = scmp.lt.s32.totalorder %s1433_s14, %s1152_s30  ;;  %p1155_p7 = scmp.lt.s32.totalorder %s1153_s9, %s1147_s24 }
  0x5d   : > { %946 = vmatpush3.bf16.xpose.msra.mxu1 %v1062_v13  ;;  %p1150_p3 = pneg %p1149_p2 }
  0x5e   : > { %968 = vmatpush3.bf16.msra.mxu0 %v1053_v4  ;;  %947 = vmatprep.subr.bf16.mxu1 %v1063_v14  ;;  %p1156_p8 = por %p1155_p7, %p1154_p4 }
  0x5f   : > { %969 = vmatprep.subr.bf16.mxu0 %v1223_v0 }
  0x60   : > { %p1157_p11 = pnand %p1156_p8, %p1150_p3 }
  0x62   : > { %970 = vmatpush3.bf16.msra.mxu0 %v1054_v5 }
  0x63   : > { %971 = vmatprep.subr.bf16.mxu0 %v1223_v0 }
  0x65   : > { %948 = vmatpush3.bf16.xpose.msra.mxu1 %v1064_v15 }
  0x66   : > { %972 = vmatpush3.bf16.msra.mxu0 %v1055_v6  ;;  %949 = vmatprep.subr.bf16.mxu1 %v1065_v16 }
  0x67   : > { %973 = vmatprep.subr.bf16.mxu0 %v1223_v0 }
  0x6a   : > { %974 = vmatpush3.bf16.msra.mxu0 %v1056_v7 }
  0x6b   : > { %975 = vmatprep.subr.bf16.mxu0 %v1223_v0 }
  0x6d   : > { %950 = vmatpush3.bf16.xpose.msra.mxu1 %v1066_v17 }
  0x6e   : > { %976 = vmatpush3.bf16.msra.mxu0 %v1057_v8  ;;  %951 = vmatprep.subr.bf16.mxu1 %v1067_v18 }
  0x71   : > { %978 = vmatmul.mubr.bf16.vlgmr.msra.gmra.mrb[0].mxu0 %v1058_v9 }
  0x75   : > { %952 = vmatpush3.bf16.xpose.msra.mxu1 %v1068_v19 }
  0x76   : > { %953 = vmatprep.subr.bf16.mxu1 %v1069_v20 }
  0x7d   : > { %954 = vmatpush3.bf16.xpose.msra.mxu1 %v1070_v21 }
  0x7e   : > { %955 = vmatprep.subr.bf16.mxu1 %v1071_v31 }
  0x85   : > { %956 = vmatpush3.bf16.xpose.msra.mxu1 %v1072_v32 }
  0x86   : > { %957 = vmatprep.subr.bf16.mxu1 %v1073_v33 }
  0x8d   : > { %958 = vmatpush3.bf16.xpose.msra.mxu1 %v1074_v34 }
 0x144   : > { %v461_v23 = vpop.f32.mrb[0].mxu0 }
 0x145   : > { %v462_v24 = vadd.f32 %v899_v22, %v461_v23  ;;  %v979_v25 = vpop.f32.mrb[1].mxu0 }
 0x146   : > { %v464_v26 = vpop.f32.mrb[2].mxu0 }
 0x147   : > { %v465_v27 = vadd.f32 %v899_v22, %v464_v26  ;;  %v980_v28 = vpop.f32.mrb[3].mxu0  ;;  %v468_v29 = vmul.f32 %v462_v24, %v462_v24 }
 0x149   : > { %470 = vadd.xlane.f32.xlu0 %v468_v29  ;;  %v469_v30 = vmul.f32 %v465_v27, %v465_v27 }
 0x14d   : > { %472 = vadd.xlane.f32.xlu0 %v469_v30 }
 0x163   : > { %704 = vperm.xlu0 %1048, %v701_v36  }
 0x1d6   : > { %v471_v37 = vpop.xlane.xlu0 %470 }
 0x1d7   : > { %v474_v38 = vadd.f32 1e-12, %v471_v37 }
 0x1d9   : > { %1075 = vrsqrt.f32 %v474_v38 }
 0x1da   : > { %v473_v39 = vpop.xlane.xlu0 %472 }
 0x1db   : > { %v475_v40 = vadd.f32 1e-12, %v473_v39 }
 0x1dd   : > { %1077 = vrsqrt.f32 %v475_v40 }
 0x1e2   : > { %v705_v49 = vpop.permute.xlu0 %704 }
 0x1e3   : > { %v1076_v41 = vpop.eup %1075  ;;  %vm709_vm1 = vcmp.eq.s32.totalorder %v663_v47, %v705_v49  ;;  %vm710_vm3 = vcmp.eq.s32.totalorder %v664_v48, %v705_v49 }
 0x1e4   : > { %v478_v43 = vmul.f32 %v1076_v41, %v462_v24 }
 0x1e7   : > { %v1078_v42 = vpop.eup %1077 }
 0x1e8   : > { %v479_v44 = vmul.f32 %v1078_v42, %v465_v27 }
 0x1ea   : > { %v481_v45 = vpack.c.bf16 %v479_v44, %v478_v43 }
 0x1ec   : > { %959 = vmatprep.mubr.bf16.mxu1 %v481_v45 }
 0x1ed   : > { %960 = vmatmul.mubr.bf16.vlgmr.msra.gmra.mrb[0].mxu1 %v481_v45 }
 0x2c0   : > { %v644_v51 = vpop.f32.mrb[0].mxu1 }
 0x2c1   : > { %v654_v52 = vmul.f32 %v653_v50, %v644_v51  ;;  %v646_v53 = vpop.f32.mrb[1].mxu1 }
 0x2c2   : > { %v655_v54 = vmul.f32 %v653_v50, %v646_v53  ;;  %v648_v55 = vpop.f32.mrb[2].mxu1 }
 0x2c3   : > { %658 = vst [vmem:[%s1415_s20] sm:$0xff] %v654_v52  ;;  %v656_v56 = vmul.f32 %v653_v50, %v648_v55  ;;  %v650_v57 = vpop.f32.mrb[3].mxu1  ;;  %v667_v58 = vsel %vm665_vm2, %v654_v52, -1e+30  ;;  %v713_v59 = vsel %vm709_vm1, %v654_v52, 0.0 }
 0x2c4   : > { %659 = vst [vmem:[%s1415_s20 + $0x8] sm:$0xff] %v655_v54  ;;  %v657_v60 = vmul.f32 %v653_v50, %v650_v57  ;;  %v671_v61 = vmax.f32 %v667_v58, -1e+30  ;;  %v714_v62 = vsel %vm710_vm3, %v655_v54, 0.0 }
 0x2c5   : > { %660 = vst [vmem:[%s1415_s20 + $0x10] sm:$0xff] %v656_v56  ;;  %v669_v63 = vsel %vm665_vm2, %v656_v56, -1e+30  ;;  %v717_v0 = vadd.f32 %v714_v62, %v713_v59 }
 0x2c6   : > { %661 = vst [vmem:[%s1415_s20 + $0x18] sm:$0xff] %v657_v60  ;;  %672 = vmax.xlane.f32.xlu1 %v671_v61  ;;  %v674_v1 = vmax.f32 %v669_v63, -1e+30 }
 0x2ca   : > { %675 = vmax.xlane.f32.xlu1 %v674_v1 }
 0x2db   : > { %707 = vperm.xlu1 %1049, %v702_v2  }
 0x353   : > { %v1424_v3 = vpop.xlane.xlu1 %672 }
 0x354   : > { %v677_v4 = vsub.f32 %v667_v58, %v1424_v3  ;;  %v678_v5 = vsub.f32 -1e+30, %v1424_v3 }
 0x356   : > { %v681_v6 = vmul.f32 1.442695, %v677_v4  ;;  %v683_v7 = vmul.f32 1.442695, %v678_v5 }
 0x357   : > { %v1428_v8 = vpop.xlane.xlu1 %675 }
 0x358   : > { %1079 = vpow2.f32 %v681_v6  ;;  %v679_v9 = vsub.f32 %v669_v63, %v1428_v8  ;;  %v680_v10 = vsub.f32 -1e+30, %v1428_v8 }
 0x359   : > { %1081 = vpow2.f32 %v683_v7 }
 0x35a   : > { %v685_v11 = vmul.f32 1.442695, %v679_v9  ;;  %v687_v12 = vmul.f32 1.442695, %v680_v10 }
 0x35b   : > { %v708_v15 = vpop.permute.xlu1 %707 }
 0x35c   : > { %1083 = vpow2.f32 %v685_v11  ;;  %vm711_vm4 = vcmp.eq.s32.totalorder %v663_v47, %v708_v15  ;;  %vm712_vm5 = vcmp.eq.s32.totalorder %v664_v48, %v708_v15 }
 0x35d   : > { %1085 = vpow2.f32 %v687_v12  ;;  %v715_v20 = vsel %vm711_vm4, %v656_v56, 0.0  ;;  %v716_v21 = vsel %vm712_vm5, %v657_v60, 0.0 }
 0x35e   : > { %v720_v22 = vadd.f32 %v716_v21, %v715_v20 }
 0x362   : > { %v1080_v13 = vpop.eup %1079 }
 0x363   : > { %v1082_v14 = vpop.eup %1081 }
 0x364   : > { %v689_v16 = vadd.f32 %v1082_v14, %v1080_v13 }
 0x366   : > { %v1084_v17 = vpop.eup %1083  ;;  %690 = vadd.xlane.f32.xlu1 %v689_v16 }
 0x367   : > { %v1086_v18 = vpop.eup %1085 }
 0x368   : > { %v692_v19 = vadd.f32 %v1086_v18, %v1084_v17 }
 0x36a   : > { %693 = vadd.xlane.f32.xlu0 %v692_v19  ;;  %718 = vadd.xlane.f32.xlu1 %v717_v0 }
 0x36e   : > { %721 = vadd.xlane.f32.xlu1 %v720_v22 }
 0x36f   : > { %1160 = shalt.err (!%p1157_p11)
}
 0x370   : > { %s1161_s16 = scalar_lea.hbm %s1439_s21, 512  ;;  %s1165_s19 = scalar_lea.hbm %s1499_s6, 1024 }
 0x371   : > { %p1162_p13 = scmp.ne.s32.totalorder %s1439_s21, %s1161_s16  ;;  %p1166_p6 = scmp.lt.u32.totalorder %s1439_s21, %s1499_s6 }
 0x372   : > { %p1167_p9 = scmp.lt.u32.totalorder %s1165_s19, %s1161_s16  ;;  %p1169_p10 = scmp.lt.u32.totalorder %s1161_s16, %s1439_s21 }
 0x373   : > { %p1163_p5 = pnand %p1162_p13, %p1513_p1 }
 0x374   : > { %p1168_p12 = por %p1167_p9, %p1166_p6 }
 0x375   : > { %p1164_p0 = pneg %p1163_p5 }
 0x376   : > { %p1170_p2 = por %p1169_p10, %p1168_p12 }
 0x378   : > { %p1171_p3 = pnand %p1170_p2, %p1164_p0 }
 0x37a   : > { %1174 = shalt.err (!%p1171_p3)
}
 0x37b   : > { %s1227_s24 = smov 256   ;;  %s1228_s25 = smov 16   ;;  %v725_v25 = vshrl.u32 %v662_v46, 7  ;;  %vm736_vm7 = vcmask 7168  }
 0x37c   : > { %989 = dma.vmem_to_hbm [thread:$0]  (%p1513_p1), %s1433_s14, 512, %s1439_s21, %s1443_s22, %s1227_s24, %s1227_s24, %s1228_s25  }
 0x37d   : > { %s925_s30 = sshll.u32 %s1293_s5, 4  ;;  %v726_v29 = vadd.s32 8, %v725_v25  ;;  %s345_s21 = scalar_lea.vmem %s1500_s7, %s896_s23 }
 0x37e   : > { %v727_v26 = vstv %s925_s30 }
 0x37f   : > { %v728_v28 = vadd.s32 %v727_v26, %v725_v25  ;;  %v729_v34 = vadd.s32 %v727_v26, %v726_v29 }
 0x381   : > { %vm730_vm6 = vcmp.lt.s32.totalorder %v728_v28, 20  ;;  %vm731_vm8 = vcmp.lt.s32.totalorder %v729_v34, 20 }
 0x3f3   : > { %v691_v23 = vpop.xlane.xlu1 %690 }
 0x3f4   : > { %1087 = vlog2.f32 %v691_v23 }
 0x3f7   : > { %v694_v24 = vpop.xlane.xlu0 %693  ;;  %v719_v31 = vpop.xlane.xlu1 %718 }
 0x3f8   : > { %1089 = vlog2.f32 %v694_v24 }
 0x3fb   : > { %v722_v39 = vpop.xlane.xlu1 %721 }
 0x3fe   : > { %v1088_v27 = vpop.eup %1087 }
 0x3ff   : > { %v696_v30 = vmul.f32 0.6931472, %v1088_v27 }
 0x401   : > { %v699_v32 = vadd.f32 %v696_v30, %v1424_v3 }
 0x402   : > { %v1090_v33 = vpop.eup %1089 }
 0x403   : > { %v732_v35 = vsub.f32 %v699_v32, %v719_v31  ;;  %v698_v36 = vmul.f32 0.6931472, %v1090_v33 }
 0x405   : > { %v734_v37 = vsel %vm730_vm6, %v732_v35, 0.0  ;;  %v700_v38 = vadd.f32 %v698_v36, %v1428_v8 }
 0x406   : > { %737 = vst.msk [vmem:[%s345_s21] sm:$0xff] %vm736_vm7, %v734_v37 }
 0x407   : > { %v733_v40 = vsub.f32 %v700_v38, %v722_v39 }
 0x409   : > { %v735_v41 = vsel %vm731_vm8, %v733_v40, 0.0 }
 0x40a   : > { %738 = vst.msk [vmem:[%s345_s21 + $0x8] sm:$0xff] %vm736_vm7, %v735_v41 }
 0x40b PF: > { %p1006_p1 = scmp.ge.s32.totalorder %s1217_s29, 2  ;;  %s778_s5 = sand.u32 1, %s1205_s26  }
 0x40c   : > { %p1514_p4 = scmp.ne.s32.totalorder %s1505_s13, 0  ;;  %s779_s17 = scalar_lea.sflag [#allocation5], %s778_s5 }
 0x40e   : > { %p999_p7 = pnand %p1006_p1, %p1514_p4 }
 0x410   : > { %1200 = dma.done.wait (!%p999_p7), %s779_s17, 512  }
 0x411   : > { %1202 = vsyncadd (!%p999_p7), %s779_s17, 4294966784  ;;  %p21_p8 = scmp.ge.s32.totalorder %s1297_s8, 4   ;;  %s1515_s26 = smov %s1209_s27 }
 0x412   : > { %s1516_s27 = smov %s1213_s28  ;;  %s1517_s28 = smov %s1308_s11 }
 0x413   : > { %s1518_s29 = smov %s1297_s8  ;;  %23 = sbr.rel (!%p21_p8) target bundleno = 7 (0x7), region = 103 }
 0x41a   :  { %792 = vsyncpa [#allocation4], 1 }
 0x41b   :  { %794 = vsyncpa [#allocation4 + $0x1], 1 }
 0x41c   :  { %795 = vsyncpa [#allocation7], 1 }
 0x41d   :  { %796 = vsyncpa [#allocation5], 1 }
 0x41e   :  { %798 = vsyncpa [#allocation5 + $0x1], 1 }

// kernel: tpu_custom_call.1
= control target key start
LH: loop header
LB: loop body
LE: loop exit
PB: predicated region body
PF: predicated region fallthrough
CT: control target
= control target key end

     0   :  { %s1493_s0 = inlined_call_operand.vmem [shape: bf16[32,128], index: 0, kind: input, shape index: {}]   ;;  %s1494_s1 = inlined_call_operand.hbm [shape: bf16[128,128], index: 1, kind: input, shape index: {}]   ;;  %s1495_s2 = inlined_call_operand.vmem [shape: f32[1,128], index: 2, kind: input, shape index: {}]   ;;  %s1496_s3 = inlined_call_operand.hbm [shape: bf16[256,128], index: 3, kind: input, shape index: {}]   ;;  %s1497_s4 = inlined_call_operand.vmem [shape: s32[32,1], index: 4, kind: input, shape index: {}]   ;;  %s1498_s5 = inlined_call_operand.<no memory space> [shape: f32[1,1], index: 5, kind: input, shape index: {}]   ;;  %s1499_s6 = inlined_call_operand.hbm [shape: f32[32,256], index: 6, kind: output, shape index: {0}]   ;;  %s1500_s7 = inlined_call_operand.vmem [shape: f32[32,1], index: 7, kind: output, shape index: {1}]  }
   0x1   :  { %13 = sst [smem:[#allocation2]] %s1498_s5 }
   0x2   :  { %14 = vsyncpa [#allocation4], 0 }
   0x3   :  { %15 = vsyncpa [#allocation7], 0 }
   0x4   :  { %16 = vsyncpa [#allocation5], 0 }
   0x5   :  { %18 = vsyncpa [#allocation5 + $0x1], 0  ;;  %s1272_s26 = smov 0   ;;  %s1274_s27 = smov 0  }
   0x6   :  { %s1276_s28 = smov 0   ;;  %s1278_s29 = smov 0  }
   0x7 LB: > { %s1293_s5 = sadd.s32 4294967295, %s1217_s29   ;;  %s884_s30 = sadd.s32 4294967294, %s1217_s29   ;;  %s1217_s29 = sphi %s1278_s29, %s1518_s29   ;;  %s1213_s28 = sphi %s1276_s28, %s1517_s28   ;;  %s1209_s27 = sphi %s1274_s27, %s1516_s27   ;;  %s1205_s26 = sphi %s1272_s26, %s1515_s26  }
   0x8   : > { %s1297_s8 = sadd.s32 1, %s1217_s29   ;;  %s167_s9 = sadd.s32 1, %s1213_s28 }
   0x9   : > { %s164_s10 = ssub.s32 %s1217_s29, %s1297_s8  ;;  %p177_p0 = scmp.ne.s32.totalorder %s1213_s28, %s1209_s27 }
   0xa   : > { %p165_p1 = scmp.eq.s32.totalorder %s164_s10, 0  ;;  %p178_p2 = scmp.eq.s32.totalorder %s1293_s5, 1 }
   0xb   : > { %p183_p3 = scmp.ne.s32.totalorder %s1209_s27, %s1205_s26  ;;  %p184_p4 = scmp.eq.s32.totalorder %s884_s30, 1 }
   0xc   : > { %s1308_s11 = scalar_select %p165_p1, %s1213_s28, %s167_s9  }
   0xd   : > { %p1310_p5 = por %p178_p2, %p177_p0  ;;  %p1314_p6 = por %p184_p4, %p183_p3 }
   0xe   : > { %p885_p7 = scmp.ge.s32.totalorder %s1217_s29, 1  ;;  %p217_p8 = scmp.lt.s32.totalorder %s1217_s29, 3 }
   0xf   : > { %s1504_s12 = scalar_select %p1310_p5, 1, 0 }
  0x10   : > { %s1505_s13 = scalar_select %p1314_p6, 1, 0 }
  0x11   : > { %p1501_p9 = scmp.eq.s32.totalorder %s1293_s5, 0  ;;  %p1321_p10 = pnand %p885_p7, %p217_p8 }
  0x12   : > { %s1219_s15 = smov [#allocation3]   ;;  %s1220_s18 = smov [#allocation6]  }
  0x13   : > { %s1506_s14 = scalar_select %p1321_p10, 1, 0 }
  0x14   : > { %s229_s16 = sshll.u32 %s1219_s15, 4  ;;  %p991_p11 = pneg %p1321_p10  ;;  %s230_s16 = int_to_ptr.vmem [resolvable:$true] %s229_s16 }
  0x15   : > { %s245_s19 = sshll.u32 %s1220_s18, 4  ;;  %s1091_s22 = scalar_lea.hbm %s1494_s1, 1024  ;;  %s1333_s19 = int_to_ptr.vmem [resolvable:$true] %s245_s19 }
  0x16   : > { %p1329_p12 = pnand %p1501_p9, %p991_p11  ;;  %p1092_p13 = scmp.ne.s32.totalorder %s1494_s1, %s1091_s22 }
  0x17   : > { %p1098_p3 = scmp.lt.u32.totalorder %s1091_s22, %s1494_s1 }
  0x18   : > { %p1093_p0 = pneg %p1329_p12 }
  0x1a   : > { %p1094_p1 = pnand %p1093_p0, %p1092_p13 }
  0x1c   : > { %p1095_p2 = pneg %p1094_p1 }
  0x1e   : > { %p1100_p4 = pnand %p1098_p3, %p1095_p2 }
  0x20   : > { %1103 = shalt.err (!%p1100_p4)
}
  0x21   : > { %s1104_s9 = scalar_lea.vmem %s230_s16, 1024  ;;  %p1112_p9 = scmp.lt.s32.totalorder %s230_s16, %s230_s16 }
  0x22   : > { %p1105_p7 = scmp.ne.s32.totalorder %s230_s16, %s1104_s9  ;;  %p1113_p6 = scmp.lt.s32.totalorder %s1104_s9, %s1104_s9 }
  0x24   : > { %p1107_p8 = pnand %p1105_p7, %p1093_p0  ;;  %p1114_p5 = por %p1113_p6, %p1112_p9 }
  0x26   : > { %p1108_p11 = pneg %p1107_p8 }
  0x28   : > { %p1115_p10 = pnand %p1114_p5, %p1108_p11 }
  0x2a   : > { %1118 = shalt.err (!%p1115_p10)
}
  0x2b   : > { %s1221_s10 = smov 64   ;;  %s1222_s15 = smov 4  }
  0x2c   : > { %994 = dma.hbm_to_vmem [thread:$0]  (!%p1329_p12), %s1494_s1, 1024, %s230_s16, [#allocation4], %s1221_s10, %s1221_s10, %s1222_s15  }
  0x2d   : > { %s1119_s23 = scalar_lea.hbm %s1496_s3, 2048 }
  0x2e   : > { %p1120_p13 = scmp.ne.s32.totalorder %s1496_s3, %s1119_s23  ;;  %p1126_p9 = scmp.lt.u32.totalorder %s1119_s23, %s1496_s3 }
  0x30   : > { %p1122_p5 = pnand %p1120_p13, %p1093_p0 }
  0x32   : > { %p1123_p6 = pneg %p1122_p5 }
  0x34   : > { %p1128_p10 = pnand %p1126_p9, %p1123_p6 }
  0x36   : > { %1131 = shalt.err (!%p1128_p10)
}
  0x37   : > { %s1132_s16 = scalar_lea.vmem %s1333_s19, 2048  ;;  %p1140_p4 = scmp.lt.s32.totalorder %s1333_s19, %s1333_s19 }
  0x38   : > { %p1133_p1 = scmp.ne.s32.totalorder %s1333_s19, %s1132_s16  ;;  %p1141_p7 = scmp.lt.s32.totalorder %s1132_s16, %s1132_s16 }
  0x3a   : > { %p1135_p2 = pnand %p1133_p1, %p1093_p0  ;;  %p1142_p8 = por %p1141_p7, %p1140_p4 }
  0x3c   : > { %p1136_p3 = pneg %p1135_p2 }
  0x3e   : > { %p1143_p11 = pnand %p1142_p8, %p1136_p3 }
  0x40   : > { %1146 = shalt.err (!%p1143_p11)
}
  0x41   : > { %997 = dma.hbm_to_vmem [thread:$0]  (!%p1329_p12), %s1496_s3, 2048, %s1333_s19, [#allocation7], %s1221_s10, %s1221_s10, %s1222_s15  }
  0x42   : > { %p1508_p13 = scmp.ne.s32.totalorder %s1506_s14, 0 }
  0x43   : > { %p1509_p5 = scmp.eq.s32.totalorder (!%p1508_p13), %s1293_s5, 0 }
  0x44   : > { %282 = sbr.rel (%p1508_p13) target bundleno = 1035 (0x40b), region = 44 }
  0x4b   : > { %1192 = dma.done.wait (%p1509_p5), [#allocation4], 1024   ;;  %p1510_p0 = pmov %p1509_p5 }
  0x4d   : > { %1194 = vsyncadd (%p1510_p0), [#allocation4], 4294966272  ;;  %p1511_p6 = pmov %p1510_p0 }
  0x4e   : > { %p1512_p9 = pmov %p1510_p0 }
  0x4f   : > { %1196 = dma.done.wait (%p1511_p6), [#allocation7], 2048  }
  0x50   : > { %1198 = vsyncadd (%p1512_p9), [#allocation7], 4294965248  ;;  %s893_s17 = sshll.u32 %s1293_s5, 1  ;;  %v1223_v0 = vmov 0.0   ;;  %vm1224_vm0 = vmmov 0   ;;  %v1050_v1 = vld [vmem:[#allocation3] sm:$0xff]   ;;  %v662_v46 = vlaneseq }
  0x51   : > { %961 = vmatprep.subr.bf16.mxu0 %v1223_v0  ;;  %977 = vmatprep.mubr.msk.bf16.mxu0 %vm1224_vm0, %v1223_v0  ;;  %p329_p12 = scmp.lt.s32.totalorder %s893_s17, 3  ;;  %v1051_v2 = vld [vmem:[#allocation3 + $0x8] sm:$0xff]   ;;  %v1052_v3 = vld [vmem:[#allocation3 + $0x10] sm:$0xff]   ;;  %v1053_v4 = vld [vmem:[#allocation3 + $0x18] sm:$0xff]   ;;  %v1225_v35 = vmov 0   ;;  %s480_s9 = sld [smem:[#allocation2]] }
  0x52   : > { %962 = vmatpush3.bf16.msra.mxu0 %v1050_v1  ;;  %v1054_v5 = vld [vmem:[#allocation3 + $0x20] sm:$0xff]   ;;  %v1055_v6 = vld [vmem:[#allocation3 + $0x28] sm:$0xff]   ;;  %v1056_v7 = vld [vmem:[#allocation3 + $0x30] sm:$0xff]   ;;  %1048 = vset.pattern.permute.xlu0 %v1225_v35  ;;  %v663_v47 = vand.u32 127, %v662_v46  ;;  %s318_s16 = sand.u32 1, %s1209_s27   ;;  %s933_s19 = sshll.u32 %s1293_s5, 9 }
  0x53   : > { %s1520_s17 = smov (!%p329_p12, %s893_s17), 3  ;;  %963 = vmatprep.subr.bf16.mxu0 %v1223_v0  ;;  %v1057_v8 = vld [vmem:[#allocation3 + $0x38] sm:$0xff]   ;;  %v1059_v10 = vld [vmem:[#allocation6 + $0x40] sm:$0xff]   ;;  %v1061_v12 = vld [vmem:[#allocation6 + $0x48] sm:$0xff]   ;;  %1049 = vset.pattern.permute.xlu1 %v1225_v35  ;;  %s892_s18 = sshll.u32 %s318_s16, 5 }
  0x54   : > { %s894_s14 = sshll.u32 %s1520_s17, 2  ;;  %v1060_v11 = vld [vmem:[#allocation6] sm:$0xff]   ;;  %943 = vmatprep.subr.bf16.mxu1 %v1059_v10  ;;  %v1062_v13 = vld [vmem:[#allocation6 + $0x8] sm:$0xff]   ;;  %v1063_v14 = vld [vmem:[#allocation6 + $0x50] sm:$0xff]   ;;  %s896_s23 = sshll.u32 %s1520_s17, 3  ;;  %v664_v48 = vadd.s32 128, %v663_v47 }
  0x55   : > { %s332_s15 = scalar_lea.vmem %s1493_s0, %s894_s14  ;;  %944 = vmatpush3.bf16.xpose.msra.mxu1 %v1060_v11  ;;  %v1064_v15 = vld [vmem:[#allocation6 + $0x10] sm:$0xff]   ;;  %v1065_v16 = vld [vmem:[#allocation6 + $0x58] sm:$0xff]   ;;  %v1067_v18 = vld [vmem:[#allocation6 + $0x60] sm:$0xff]   ;;  %s1408_s30 = scalar_lea.vmem %s1497_s4, %s896_s23  ;;  %vm665_vm2 = vcmp.lt.s32.totalorder %v663_v47, 10 }
  0x56   : > { %964 = vmatpush3.bf16.msra.mxu0 %v1051_v2  ;;  %v1058_v9 = vld [vmem:[%s332_s15] sm:$0xff]   ;;  %945 = vmatprep.subr.bf16.mxu1 %v1061_v12  ;;  %v1066_v17 = vld [vmem:[#allocation6 + $0x18] sm:$0xff]   ;;  %v1069_v20 = vld [vmem:[#allocation6 + $0x68] sm:$0xff]   ;;  %s1415_s20 = scalar_lea.vmem [#allocation8], %s892_s18  ;;  %s1439_s21 = scalar_lea.hbm %s1499_s6, %s933_s19 }
  0x57   : > { %965 = vmatprep.subr.bf16.mxu0 %v1223_v0  ;;  %v1068_v19 = vld [vmem:[#allocation6 + $0x20] sm:$0xff]   ;;  %v1070_v21 = vld [vmem:[#allocation6 + $0x28] sm:$0xff]   ;;  %v1071_v31 = vld [vmem:[#allocation6 + $0x70] sm:$0xff]   ;;  %v653_v50 = vstv %s480_s9  ;;  %s759_s14 = sshll.u32 %s1415_s20, 4  ;;  %s1443_s22 = scalar_lea.sflag [#allocation5], %s318_s16  ;;  %s1433_s14 = int_to_ptr.vmem [resolvable:$true] %s759_s14 }
  0x58   : > { %v899_v22 = vld [vmem:[%s1495_s2] ss:$0 sm:$0xff]  ;;  %v1072_v32 = vld [vmem:[#allocation6 + $0x30] sm:$0xff]   ;;  %v1073_v33 = vld [vmem:[#allocation6 + $0x78] sm:$0xff]   ;;  %s1147_s24 = scalar_lea.vmem %s1433_s14, 512  ;;  %p1513_p1 = scmp.ne.s32.totalorder %s1504_s12, 0 }
  0x59   : > { %v1074_v34 = vld [vmem:[#allocation6 + $0x38] sm:$0xff]   ;;  %v701_v36 = vld [vmem:[%s1408_s30] sm:$0xff]  ;;  %v702_v2 = vld [vmem:[%s1408_s30 + $0x8] sm:$0xff]  ;;  %p1148_p10 = scmp.ne.s32.totalorder %s1433_s14, %s1147_s24  ;;  %s1226_s25 = smov [#allocation8]  }
  0x5a   : > { %966 = vmatpush3.bf16.msra.mxu0 %v1052_v3  ;;  %s1151_s30 = sshll.u32 %s1226_s25, 4  ;;  %s1152_s30 = int_to_ptr.vmem [resolvable:$false] %s1151_s30 }
  0x5b   : > { %967 = vmatprep.subr.bf16.mxu0 %v1223_v0  ;;  %p1149_p2 = pnand %p1148_p10, %p1513_p1  ;;  %s1153_s9 = scalar_lea.vmem %s1152_s30, 1024 }
  0x5c   : > { %p1154_p4 = scmp.lt.s32.totalorder %s1433_s14, %s1152_s30  ;;  %p1155_p7 = scmp.lt.s32.totalorder %s1153_s9, %s1147_s24 }
  0x5d   : > { %946 = vmatpush3.bf16.xpose.msra.mxu1 %v1062_v13  ;;  %p1150_p3 = pneg %p1149_p2 }
  0x5e   : > { %968 = vmatpush3.bf16.msra.mxu0 %v1053_v4  ;;  %947 = vmatprep.subr.bf16.mxu1 %v1063_v14  ;;  %p1156_p8 = por %p1155_p7, %p1154_p4 }
  0x5f   : > { %969 = vmatprep.subr.bf16.mxu0 %v1223_v0 }
  0x60   : > { %p1157_p11 = pnand %p1156_p8, %p1150_p3 }
  0x62   : > { %970 = vmatpush3.bf16.msra.mxu0 %v1054_v5 }
  0x63   : > { %971 = vmatprep.subr.bf16.mxu0 %v1223_v0 }
  0x65   : > { %948 = vmatpush3.bf16.xpose.msra.mxu1 %v1064_v15 }
  0x66   : > { %972 = vmatpush3.bf16.msra.mxu0 %v1055_v6  ;;  %949 = vmatprep.subr.bf16.mxu1 %v1065_v16 }
  0x67   : > { %973 = vmatprep.subr.bf16.mxu0 %v1223_v0 }
  0x6a   : > { %974 = vmatpush3.bf16.msra.mxu0 %v1056_v7 }
  0x6b   : > { %975 = vmatprep.subr.bf16.mxu0 %v1223_v0 }
  0x6d   : > { %950 = vmatpush3.bf16.xpose.msra.mxu1 %v1066_v17 }
  0x6e   : > { %976 = vmatpush3.bf16.msra.mxu0 %v1057_v8  ;;  %951 = vmatprep.subr.bf16.mxu1 %v1067_v18 }
  0x71   : > { %978 = vmatmul.mubr.bf16.vlgmr.msra.gmra.mrb[0].mxu0 %v1058_v9 }
  0x75   : > { %952 = vmatpush3.bf16.xpose.msra.mxu1 %v1068_v19 }
  0x76   : > { %953 = vmatprep.subr.bf16.mxu1 %v1069_v20 }
  0x7d   : > { %954 = vmatpush3.bf16.xpose.msra.mxu1 %v1070_v21 }
  0x7e   : > { %955 = vmatprep.subr.bf16.mxu1 %v1071_v31 }
  0x85   : > { %956 = vmatpush3.bf16.xpose.msra.mxu1 %v1072_v32 }
  0x86   : > { %957 = vmatprep.subr.bf16.mxu1 %v1073_v33 }
  0x8d   : > { %958 = vmatpush3.bf16.xpose.msra.mxu1 %v1074_v34 }
 0x144   : > { %v461_v23 = vpop.f32.mrb[0].mxu0 }
 0x145   : > { %v462_v24 = vadd.f32 %v899_v22, %v461_v23  ;;  %v979_v25 = vpop.f32.mrb[1].mxu0 }
 0x146   : > { %v464_v26 = vpop.f32.mrb[2].mxu0 }
 0x147   : > { %v465_v27 = vadd.f32 %v899_v22, %v464_v26  ;;  %v980_v28 = vpop.f32.mrb[3].mxu0  ;;  %v468_v29 = vmul.f32 %v462_v24, %v462_v24 }
 0x149   : > { %470 = vadd.xlane.f32.xlu0 %v468_v29  ;;  %v469_v30 = vmul.f32 %v465_v27, %v465_v27 }
 0x14d   : > { %472 = vadd.xlane.f32.xlu0 %v469_v30 }
 0x163   : > { %704 = vperm.xlu0 %1048, %v701_v36  }
 0x1d6   : > { %v471_v37 = vpop.xlane.xlu0 %470 }
 0x1d7   : > { %v474_v38 = vadd.f32 1e-12, %v471_v37 }
 0x1d9   : > { %1075 = vrsqrt.f32 %v474_v38 }
 0x1da   : > { %v473_v39 = vpop.xlane.xlu0 %472 }
 0x1db   : > { %v475_v40 = vadd.f32 1e-12, %v473_v39 }
 0x1dd   : > { %1077 = vrsqrt.f32 %v475_v40 }
 0x1e2   : > { %v705_v49 = vpop.permute.xlu0 %704 }
 0x1e3   : > { %v1076_v41 = vpop.eup %1075  ;;  %vm709_vm1 = vcmp.eq.s32.totalorder %v663_v47, %v705_v49  ;;  %vm710_vm3 = vcmp.eq.s32.totalorder %v664_v48, %v705_v49 }
 0x1e4   : > { %v478_v43 = vmul.f32 %v1076_v41, %v462_v24 }
 0x1e7   : > { %v1078_v42 = vpop.eup %1077 }
 0x1e8   : > { %v479_v44 = vmul.f32 %v1078_v42, %v465_v27 }
 0x1ea   : > { %v481_v45 = vpack.c.bf16 %v479_v44, %v478_v43 }
 0x1ec   : > { %959 = vmatprep.mubr.bf16.mxu1 %v481_v45 }
 0x1ed   : > { %960 = vmatmul.mubr.bf16.vlgmr.msra.gmra.mrb[0].mxu1 %v481_v45 }
 0x2c0   : > { %v644_v51 = vpop.f32.mrb[0].mxu1 }
 0x2c1   : > { %v654_v52 = vmul.f32 %v653_v50, %v644_v51  ;;  %v646_v53 = vpop.f32.mrb[1].mxu1 }
 0x2c2   : > { %v655_v54 = vmul.f32 %v653_v50, %v646_v53  ;;  %v648_v55 = vpop.f32.mrb[2].mxu1 }
 0x2c3   : > { %658 = vst [vmem:[%s1415_s20] sm:$0xff] %v654_v52  ;;  %v656_v56 = vmul.f32 %v653_v50, %v648_v55  ;;  %v650_v57 = vpop.f32.mrb[3].mxu1  ;;  %v667_v58 = vsel %vm665_vm2, %v654_v52, -1e+30  ;;  %v713_v59 = vsel %vm709_vm1, %v654_v52, 0.0 }
 0x2c4   : > { %659 = vst [vmem:[%s1415_s20 + $0x8] sm:$0xff] %v655_v54  ;;  %v657_v60 = vmul.f32 %v653_v50, %v650_v57  ;;  %v671_v61 = vmax.f32 %v667_v58, -1e+30  ;;  %v714_v62 = vsel %vm710_vm3, %v655_v54, 0.0 }
 0x2c5   : > { %660 = vst [vmem:[%s1415_s20 + $0x10] sm:$0xff] %v656_v56  ;;  %v669_v63 = vsel %vm665_vm2, %v656_v56, -1e+30  ;;  %v717_v0 = vadd.f32 %v714_v62, %v713_v59 }
 0x2c6   : > { %661 = vst [vmem:[%s1415_s20 + $0x18] sm:$0xff] %v657_v60  ;;  %672 = vmax.xlane.f32.xlu1 %v671_v61  ;;  %v674_v1 = vmax.f32 %v669_v63, -1e+30 }
 0x2ca   : > { %675 = vmax.xlane.f32.xlu1 %v674_v1 }
 0x2db   : > { %707 = vperm.xlu1 %1049, %v702_v2  }
 0x353   : > { %v1424_v3 = vpop.xlane.xlu1 %672 }
 0x354   : > { %v677_v4 = vsub.f32 %v667_v58, %v1424_v3  ;;  %v678_v5 = vsub.f32 -1e+30, %v1424_v3 }
 0x356   : > { %v681_v6 = vmul.f32 1.442695, %v677_v4  ;;  %v683_v7 = vmul.f32 1.442695, %v678_v5 }
 0x357   : > { %v1428_v8 = vpop.xlane.xlu1 %675 }
 0x358   : > { %1079 = vpow2.f32 %v681_v6  ;;  %v679_v9 = vsub.f32 %v669_v63, %v1428_v8  ;;  %v680_v10 = vsub.f32 -1e+30, %v1428_v8 }
 0x359   : > { %1081 = vpow2.f32 %v683_v7 }
 0x35a   : > { %v685_v11 = vmul.f32 1.442695, %v679_v9  ;;  %v687_v12 = vmul.f32 1.442695, %v680_v10 }
 0x35b   : > { %v708_v15 = vpop.permute.xlu1 %707 }
 0x35c   : > { %1083 = vpow2.f32 %v685_v11  ;;  %vm711_vm4 = vcmp.eq.s32.totalorder %v663_v47, %v708_v15  ;;  %vm712_vm5 = vcmp.eq.s32.totalorder %v664_v48, %v708_v15 }
 0x35d   : > { %1085 = vpow2.f32 %v687_v12  ;;  %v715_v20 = vsel %vm711_vm4, %v656_v56, 0.0  ;;  %v716_v21 = vsel %vm712_vm5, %v657_v60, 0.0 }
 0x35e   : > { %v720_v22 = vadd.f32 %v716_v21, %v715_v20 }
 0x362   : > { %v1080_v13 = vpop.eup %1079 }
 0x363   : > { %v1082_v14 = vpop.eup %1081 }
 0x364   : > { %v689_v16 = vadd.f32 %v1082_v14, %v1080_v13 }
 0x366   : > { %v1084_v17 = vpop.eup %1083  ;;  %690 = vadd.xlane.f32.xlu1 %v689_v16 }
 0x367   : > { %v1086_v18 = vpop.eup %1085 }
 0x368   : > { %v692_v19 = vadd.f32 %v1086_v18, %v1084_v17 }
 0x36a   : > { %693 = vadd.xlane.f32.xlu0 %v692_v19  ;;  %718 = vadd.xlane.f32.xlu1 %v717_v0 }
 0x36e   : > { %721 = vadd.xlane.f32.xlu1 %v720_v22 }
 0x36f   : > { %1160 = shalt.err (!%p1157_p11)
}
 0x370   : > { %s1161_s16 = scalar_lea.hbm %s1439_s21, 512  ;;  %s1165_s19 = scalar_lea.hbm %s1499_s6, 1024 }
 0x371   : > { %p1162_p13 = scmp.ne.s32.totalorder %s1439_s21, %s1161_s16  ;;  %p1166_p6 = scmp.lt.u32.totalorder %s1439_s21, %s1499_s6 }
 0x372   : > { %p1167_p9 = scmp.lt.u32.totalorder %s1165_s19, %s1161_s16  ;;  %p1169_p10 = scmp.lt.u32.totalorder %s1161_s16, %s1439_s21 }
 0x373   : > { %p1163_p5 = pnand %p1162_p13, %p1513_p1 }
 0x374   : > { %p1168_p12 = por %p1167_p9, %p1166_p6 }
 0x375   : > { %p1164_p0 = pneg %p1163_p5 }
 0x376   : > { %p1170_p2 = por %p1169_p10, %p1168_p12 }
 0x378   : > { %p1171_p3 = pnand %p1170_p2, %p1164_p0 }
 0x37a   : > { %1174 = shalt.err (!%p1171_p3)
}
 0x37b   : > { %s1227_s24 = smov 256   ;;  %s1228_s25 = smov 16   ;;  %v725_v25 = vshrl.u32 %v662_v46, 7  ;;  %vm736_vm7 = vcmask 7168  }
 0x37c   : > { %989 = dma.vmem_to_hbm [thread:$0]  (%p1513_p1), %s1433_s14, 512, %s1439_s21, %s1443_s22, %s1227_s24, %s1227_s24, %s1228_s25  }
 0x37d   : > { %s925_s30 = sshll.u32 %s1293_s5, 4  ;;  %v726_v29 = vadd.s32 8, %v725_v25  ;;  %s345_s21 = scalar_lea.vmem %s1500_s7, %s896_s23 }
 0x37e   : > { %v727_v26 = vstv %s925_s30 }
 0x37f   : > { %v728_v28 = vadd.s32 %v727_v26, %v725_v25  ;;  %v729_v34 = vadd.s32 %v727_v26, %v726_v29 }
 0x381   : > { %vm730_vm6 = vcmp.lt.s32.totalorder %v728_v28, 20  ;;  %vm731_vm8 = vcmp.lt.s32.totalorder %v729_v34, 20 }
 0x3f3   : > { %v691_v23 = vpop.xlane.xlu1 %690 }
 0x3f4   : > { %1087 = vlog2.f32 %v691_v23 }
 0x3f7   : > { %v694_v24 = vpop.xlane.xlu0 %693  ;;  %v719_v31 = vpop.xlane.xlu1 %718 }
 0x3f8   : > { %1089 = vlog2.f32 %v694_v24 }
 0x3fb   : > { %v722_v39 = vpop.xlane.xlu1 %721 }
 0x3fe   : > { %v1088_v27 = vpop.eup %1087 }
 0x3ff   : > { %v696_v30 = vmul.f32 0.6931472, %v1088_v27 }
 0x401   : > { %v699_v32 = vadd.f32 %v696_v30, %v1424_v3 }
 0x402   : > { %v1090_v33 = vpop.eup %1089 }
 0x403   : > { %v732_v35 = vsub.f32 %v699_v32, %v719_v31  ;;  %v698_v36 = vmul.f32 0.6931472, %v1090_v33 }
 0x405   : > { %v734_v37 = vsel %vm730_vm6, %v732_v35, 0.0  ;;  %v700_v38 = vadd.f32 %v698_v36, %v1428_v8 }
 0x406   : > { %737 = vst.msk [vmem:[%s345_s21] sm:$0xff] %vm736_vm7, %v734_v37 }
 0x407   : > { %v733_v40 = vsub.f32 %v700_v38, %v722_v39 }
 0x409   : > { %v735_v41 = vsel %vm731_vm8, %v733_v40, 0.0 }
 0x40a   : > { %738 = vst.msk [vmem:[%s345_s21 + $0x8] sm:$0xff] %vm736_vm7, %v735_v41 }
 0x40b PF: > { %p1006_p1 = scmp.ge.s32.totalorder %s1217_s29, 2  ;;  %s778_s5 = sand.u32 1, %s1205_s26  }
 0x40c   : > { %p1514_p4 = scmp.ne.s32.totalorder %s1505_s13, 0  ;;  %s779_s17 = scalar_lea.sflag [#allocation5], %s778_s5 }
 0x40e   : > { %p999_p7 = pnand %p1006_p1, %p1514_p4 }
 0x410   : > { %1200 = dma.done.wait (!%p999_p7), %s779_s17, 512  }
 0x411   : > { %1202 = vsyncadd (!%p999_p7), %s779_s17, 4294966784  ;;  %p21_p8 = scmp.ge.s32.totalorder %s1297_s8, 4   ;;  %s1515_s26 = smov %s1209_s27 }
 0x412   : > { %s1516_s27 = smov %s1213_s28  ;;  %s1517_s28 = smov %s1308_s11 }
 0x413   : > { %s1518_s29 = smov %s1297_s8  ;;  %23 = sbr.rel (!%p21_p8) target bundleno = 7 (0x7), region = 103 }
 0x41a   :  { %792 = vsyncpa [#allocation4], 1 }
 0x41b   :  { %794 = vsyncpa [#allocation4 + $0x1], 1 }
 0x41c   :  { %795 = vsyncpa [#allocation7], 1 }
 0x41d   :  { %796 = vsyncpa [#allocation5], 1 }
 0x41e   :  { %798 = vsyncpa [#allocation5 + $0x1], 1 }

</bundles_post_ra>
